<compile_context>
chip_gen: v5e
topology: v5e:2x2
jax: 0.10.0
libtpu: 0.0.40
codegen_flags: <defaults>
</compile_context>

<pallas_src>
import functools

import numpy as np
import jax
import jax.numpy as jnp
from jax import lax
from jax.experimental import pallas as pl
from jax.experimental.pallas import tpu as pltpu

LN_EPS = 1e-5   # nn.LayerNorm default eps
GN_EPS = 1e-5   # nn.GroupNorm default eps


def _msef_kernel(x_ref, par_ref, mask_ref, out_ref, *, C, W, HW, BT, perm):
    # ---- grid-invariant parameters (loaded once per step; DMA'd once for the whole grid)
    par = par_ref[...]                       # (C, 15)
    ln_s = par[:, 0:1]                       # folded LayerNorm scale  (ln_w * gamma)
    ln_b = par[:, 1:2]                       # folded LayerNorm shift  (ln_b * gamma + beta)
    conv_b = par[:, 2:3]                     # depthwise conv bias
    a_coef = par[:, 3:4]                     # gate coefficients (see fold above)
    bm1 = par[:, 4:5]
    bc = par[:, 5:6]
    cw = par[:, 6:15]                        # (C, 9) 3x3 depthwise conv weights, row-major taps

    not_left = mask_ref[0:1, :]              # (1, HW): 0 where w == 0
    not_right = mask_ref[1:2, :]             # (1, HW): 0 where w == W-1
    not_top = mask_ref[2:3, :]               # (1, HW): 0 where h == 0
    not_bottom = mask_ref[3:4, :]            # (1, HW): 0 where h == H-1

    for i in range(BT):                      # unrolled batch tile
        x = x_ref[i]                                             # (C, HW) f32

        # ---- LayerNorm over channels per pixel (affine + gamma/beta pre-folded).
        mean = jnp.mean(x, axis=0, keepdims=True)                # (1, HW)
        var = jnp.mean((x - mean) ** 2, axis=0, keepdims=True)   # biased variance (torch LN)
        xn = (x - mean) * lax.rsqrt(var + LN_EPS)
        xn = xn * ln_s + ln_b                                    # (C, HW)

        # ---- 3x3 depthwise conv, padding=1, all channels at once, in registers.
        # Column-shifted taps (dx = -1 / +1) via XLU lane rolls, edge-masked once.
        col_m1 = pltpu.roll(xn, 1, axis=1) * not_left            # x_norm[h, w-1]
        col_p1 = pltpu.roll(xn, HW - 1, axis=1) * not_right      # x_norm[h, w+1]
        # Per-conv-row weighted sums (weights are per-channel (C,1) columns of cw).
        s_m1 = cw[:, 0:1] * col_m1 + cw[:, 1:2] * xn + cw[:, 2:3] * col_p1   # kh = 0 (dy = -1)
        s_0 = cw[:, 3:4] * col_m1 + cw[:, 4:5] * xn + cw[:, 5:6] * col_p1    # kh = 1 (dy =  0)
        s_p1 = cw[:, 6:7] * col_m1 + cw[:, 7:8] * xn + cw[:, 8:9] * col_p1   # kh = 2 (dy = +1)
        # Row shifts of the whole per-row sums (+/-W lane rolls), top/bottom masked.
        x1 = (not_top * pltpu.roll(s_m1, W, axis=1)
              + s_0
              + not_bottom * pltpu.roll(s_p1, HW - W, axis=1)
              + conv_b)                                          # (C, HW)

        # ---- ShuffleAttention gate, folded to sigmoid(A*xn + B) with per-channel scalars.
        m = jnp.mean(xn, axis=1, keepdims=True)                  # (C, 1) per-channel mean
        cen = xn - m
        v = jnp.mean(cen * cen, axis=1, keepdims=True)           # biased variance (GroupNorm)
        istd = lax.rsqrt(v + GN_EPS)
        a = a_coef * istd                                        # (C, 1)
        gate = jax.nn.sigmoid(a * xn + (bm1 - a) * m + bc)       # (C, HW)
        attn = xn * gate                                         # pre-shuffle attention output

        # ---- channel_shuffle (static sublane gather) + fuse + residual: one dense store.
        attn_perm = jnp.concatenate([attn[o:o + 1] for o in perm], axis=0)   # (C, HW)
        out_ref[i] = x1 * attn_perm + x


def msef_block_pallas(x, params, groups, *, bt=None):
    B, C, H, W = x.shape
    HW = H * W
    cg = C // groups            # channels per ShuffleAttention group
    half = cg // 2              # == channels // (2 * groups)
    assert cg * groups == C and 2 * half == cg
    assert C % 2 == 0
    # Lane-dense assumption: full-lane vector loads/stores and roll-based conv need HW % 128 == 0.
    assert HW % 128 == 0, "msef_block_pallas assumes H*W is a multiple of 128"

    # ---- batch tile: divisor of B, small enough for VMEM, and keep >= 2 grid steps (v7x: 2 TCs).
    if bt is None:
        bt = 1
        budget = 2 * 1024 * 1024                      # per-block bytes (in + out double-buffered)
        for cand in range(1, B + 1):
            if B % cand != 0:
                continue
            if cand * C * HW * 4 > budget:
                continue
            if B // cand >= 2 or B == 1:
                bt = cand
    assert B % bt == 0

    # ---- fold LayerNorm weight/bias with gamma/beta into one per-channel affine.
    ln_scale = params["ln_weight"] * params["gamma"]
    ln_shift = params["ln_bias"] * params["gamma"] + params["beta"]
    conv_w = params["conv_weight"].reshape(C, 9)                  # (C,1,3,3) -> (C,9)
    conv_b = params["conv_bias"]

    # ---- fold the two ShuffleAttention branches into gate = sigmoid(A_coef*istd*xn + B),
    #      B = (Bm1 - A_coef*istd)*m + Bc, with per-original-channel constants.
    j_idx = np.arange(C) % cg
    first_mask = j_idx < half                     # True -> channel(avg-pool) branch
    r_idx = np.where(first_mask, j_idx, j_idx - half)
    fm = jnp.asarray(first_mask)
    cw_r = params["cweight"][r_idx]
    cb_r = params["cbias"][r_idx]
    sw_r = params["sweight"][r_idx]
    sb_r = params["sbias"][r_idx]
    gw_r = params["gn_weight"][r_idx]
    gb_r = params["gn_bias"][r_idx]
    a_coef = jnp.where(fm, 0.0, sw_r * gw_r)
    bm1 = jnp.where(fm, cw_r, 0.0)
    bc = jnp.where(fm, cb_r, sw_r * gb_r + sb_r)

    packed = jnp.concatenate(
        [ln_scale.reshape(C, 1), ln_shift.reshape(C, 1), conv_b.reshape(C, 1),
         a_coef.reshape(C, 1), bm1.reshape(C, 1), bc.reshape(C, 1), conv_w],
        axis=1).astype(jnp.float32)                               # (C, 15)

    # ---- constant edge masks for the conv taps (hoisted out of the kernel).
    q = np.arange(HW)
    wq = q % W
    masks = jnp.asarray(np.stack(
        [(wq != 0), (wq != W - 1), (q >= W), (q < HW - W)], axis=0).astype(np.float32))  # (4, HW)

    # channel_shuffle with 2 groups: new channel c comes from old channel perm[c]
    perm = tuple(int((c % 2) * (C // 2) + c // 2) for c in range(C))

    kernel = functools.partial(_msef_kernel, C=C, W=W, HW=HW, BT=bt, perm=perm)

    x_flat = x.reshape(B, C, HW).astype(jnp.float32)

    out_flat = pl.pallas_call(
        kernel,
        out_shape=jax.ShapeDtypeStruct((B, C, HW), jnp.float32),
        grid=(B // bt,),
        in_specs=[
            pl.BlockSpec((bt, C, HW), lambda b: (b, 0, 0)),
            pl.BlockSpec((C, 15), lambda b: (0, 0)),      # grid-invariant: fetched once
            pl.BlockSpec((4, HW), lambda b: (0, 0)),      # grid-invariant: fetched once
        ],
        out_specs=pl.BlockSpec((bt, C, HW), lambda b: (b, 0, 0)),
        compiler_params=pltpu.CompilerParams(
            dimension_semantics=("parallel",),            # batch steps independent -> both TCs on v7x
            # TODO(synk): re-derive per-generation VMEM budget / row-tiling for large C,H,W
            # (v7x has 64 MiB VMEM vs 128 MiB on v5e/v6e); 32 MiB is ample at these sizes.
            vmem_limit_bytes=32 * 1024 * 1024),
    )(x_flat, packed, masks)
    return out_flat.reshape(B, C, H, W)


def msef_block_ref(x, params, groups):
    """Pure-JAX reference mirroring the PyTorch forward semantics."""
    B, C, H, W = x.shape
    cg = C // groups
    half = cg // 2

    # LayerNormalization
    mean = jnp.mean(x, axis=1, keepdims=True)
    var = jnp.mean((x - mean) ** 2, axis=1, keepdims=True)
    xhat = (x - mean) * lax.rsqrt(var + LN_EPS)
    xn = xhat * params["ln_weight"].reshape(1, C, 1, 1) + params["ln_bias"].reshape(1, C, 1, 1)
    x_norm = xn * params["gamma"].reshape(1, C, 1, 1) + params["beta"].reshape(1, C, 1, 1)

    # depthwise 3x3 conv, padding=1
    xp = jnp.pad(x_norm, ((0, 0), (0, 0), (1, 1), (1, 1)))
    w = params["conv_weight"][:, 0]                                 # (C, 3, 3)
    x1 = jnp.zeros_like(x_norm)
    for kh in range(3):
        for kw in range(3):
            x1 = x1 + w[:, kh, kw].reshape(1, C, 1, 1) * xp[:, :, kh:kh + H, kw:kw + W]
    x1 = x1 + params["conv_bias"].reshape(1, C, 1, 1)

    # ShuffleAttention
    xr = x_norm.reshape(B * groups, cg, H, W)
    x0, x1g = xr[:, :half], xr[:, half:]
    pool = jnp.mean(x0, axis=(2, 3), keepdims=True)
    cn = params["cweight"].reshape(1, half, 1, 1) * pool + params["cbias"].reshape(1, half, 1, 1)
    branch_c = x0 * jax.nn.sigmoid(cn)
    m = jnp.mean(x1g, axis=(2, 3), keepdims=True)
    v = jnp.mean((x1g - m) ** 2, axis=(2, 3), keepdims=True)
    gn = (x1g - m) * lax.rsqrt(v + GN_EPS)
    gn = gn * params["gn_weight"].reshape(1, half, 1, 1) + params["gn_bias"].reshape(1, half, 1, 1)
    sn = params["sweight"].reshape(1, half, 1, 1) * gn + params["sbias"].reshape(1, half, 1, 1)
    branch_s = x1g * jax.nn.sigmoid(sn)
    out = jnp.concatenate([branch_c, branch_s], axis=1).reshape(B, C, H, W)
    out = out.reshape(B, 2, C // 2, H, W).transpose(0, 2, 1, 3, 4).reshape(B, C, H, W)
    x2 = out

    return x1 * x2 + x


def make_params(key, filters, groups):
    C = filters
    half = C // (2 * groups)
    ks = jax.random.split(key, 12)
    rnd = lambda k, shape, s: s * jax.random.normal(k, shape, jnp.float32)
    return dict(
        ln_weight=1.0 + rnd(ks[0], (C,), 0.1),
        ln_bias=rnd(ks[1], (C,), 0.1),
        gamma=1.0 + rnd(ks[2], (C,), 0.1),
        beta=rnd(ks[3], (C,), 0.1),
        conv_weight=rnd(ks[4], (C, 1, 3, 3), 0.3),   # depthwise conv weight (kaiming-like random)
        conv_bias=rnd(ks[5], (C,), 0.1),
        cweight=rnd(ks[6], (half,), 0.3),
        cbias=1.0 + rnd(ks[7], (half,), 0.1),
        sweight=rnd(ks[8], (half,), 0.3),
        sbias=1.0 + rnd(ks[9], (half,), 0.1),
        gn_weight=1.0 + rnd(ks[10], (half,), 0.1),
        gn_bias=rnd(ks[11], (half,), 0.1),
    )


if __name__ == "__main__":
    B, C, H, W = 2, 8, 16, 16
    groups = 2   # module default is 64, which requires >=128 channels; use 2 for small C=8

    key = jax.random.PRNGKey(0)
    kx, kp = jax.random.split(key)
    x = jax.random.normal(kx, (B, C, H, W), jnp.float32)
    params = make_params(kp, C, groups)

    out = jax.block_until_ready(msef_block_pallas(x, params, groups))
    ref = jax.block_until_ready(msef_block_ref(x, params, groups))

    assert out.shape == (B, C, H, W)
    max_err = float(jnp.max(jnp.abs(out - ref)))
    if not bool(jnp.allclose(out, ref, atol=1e-4, rtol=1e-4)):
        raise SystemExit(f"mismatch vs reference: max_err={max_err}")
    print("KERNEL_OK")
</pallas_src>

<mosaic_0001>
module attributes {stable_mosaic.version = 11 : i64} {
  func.func @_msef_kernel(%arg0: i32, %arg1: memref<1x8x256xf32, #tpu.memory_space<vmem>>, %arg2: memref<8x15xf32, #tpu.memory_space<vmem>>, %arg3: memref<4x256xf32, #tpu.memory_space<vmem>>, %arg4: memref<1x8x256xf32, #tpu.memory_space<vmem>>) attributes {dimension_semantics = [#tpu.dimension_semantics<parallel>], iteration_bounds = array<i64: 2>, scalar_prefetch = 0 : i64, scratch_operands = 0 : i64, tpu.core_type = #tpu.core_type<tc>, window_params = [{transform_indices = @transform_0, window_bounds = array<i64: 1, 8, 256>}, {pipeline_mode = #tpu.pipeline_mode<synchronous>, transform_indices = @transform_1, window_bounds = array<i64: 8, 15>}, {pipeline_mode = #tpu.pipeline_mode<synchronous>, transform_indices = @transform_2, window_bounds = array<i64: 4, 256>}, {transform_indices = @transform_3, window_bounds = array<i64: 1, 8, 256>}]} {
    %c0 = arith.constant 0 : index
    %c0_0 = arith.constant 0 : index
    %0 = vector.load %arg2[%c0, %c0_0] : memref<8x15xf32, #tpu.memory_space<vmem>>, vector<8x15xf32>
    %1 = vector.extract_strided_slice %0 {offsets = [0, 0], sizes = [8, 1], strides = [1, 1]} : vector<8x15xf32> to vector<8x1xf32>
    %2 = vector.extract_strided_slice %0 {offsets = [0, 1], sizes = [8, 1], strides = [1, 1]} : vector<8x15xf32> to vector<8x1xf32>
    %3 = vector.extract_strided_slice %0 {offsets = [0, 2], sizes = [8, 1], strides = [1, 1]} : vector<8x15xf32> to vector<8x1xf32>
    %4 = vector.extract_strided_slice %0 {offsets = [0, 3], sizes = [8, 1], strides = [1, 1]} : vector<8x15xf32> to vector<8x1xf32>
    %5 = vector.extract_strided_slice %0 {offsets = [0, 4], sizes = [8, 1], strides = [1, 1]} : vector<8x15xf32> to vector<8x1xf32>
    %6 = vector.extract_strided_slice %0 {offsets = [0, 5], sizes = [8, 1], strides = [1, 1]} : vector<8x15xf32> to vector<8x1xf32>
    %7 = vector.extract_strided_slice %0 {offsets = [0, 6], sizes = [8, 9], strides = [1, 1]} : vector<8x15xf32> to vector<8x9xf32>
    %c0_1 = arith.constant 0 : index
    %c0_2 = arith.constant 0 : index
    %8 = vector.load %arg3[%c0_1, %c0_2] : memref<4x256xf32, #tpu.memory_space<vmem>>, vector<1x256xf32>
    %c1 = arith.constant 1 : index
    %c0_3 = arith.constant 0 : index
    %9 = vector.load %arg3[%c1, %c0_3] : memref<4x256xf32, #tpu.memory_space<vmem>>, vector<1x256xf32>
    %c2 = arith.constant 2 : index
    %c0_4 = arith.constant 0 : index
    %10 = vector.load %arg3[%c2, %c0_4] : memref<4x256xf32, #tpu.memory_space<vmem>>, vector<1x256xf32>
    %c3 = arith.constant 3 : index
    %c0_5 = arith.constant 0 : index
    %11 = vector.load %arg3[%c3, %c0_5] : memref<4x256xf32, #tpu.memory_space<vmem>>, vector<1x256xf32>
    %c0_6 = arith.constant 0 : index
    %c0_7 = arith.constant 0 : index
    %c0_8 = arith.constant 0 : index
    %12 = vector.load %arg1[%c0_6, %c0_7, %c0_8] : memref<1x8x256xf32, #tpu.memory_space<vmem>>, vector<1x8x256xf32>
    %13 = vector.shape_cast %12 : vector<1x8x256xf32> to vector<8x256xf32>
    %cst = arith.constant dense<0.000000e+00> : vector<256xf32>
    %14 = vector.multi_reduction <add>, %13, %cst [0] : vector<8x256xf32> to vector<256xf32>
    %15 = vector.shape_cast %14 : vector<256xf32> to vector<1x256xf32>
    %cst_9 = arith.constant 8.000000e+00 : f32
    %16 = vector.broadcast %cst_9 : f32 to vector<1x256xf32>
    %17 = arith.divf %15, %16 : vector<1x256xf32>
    %18 = vector.broadcast %17 : vector<1x256xf32> to vector<8x256xf32>
    %19 = arith.subf %13, %18 : vector<8x256xf32>
    %20 = arith.mulf %19, %19 : vector<8x256xf32>
    %cst_10 = arith.constant dense<0.000000e+00> : vector<256xf32>
    %21 = vector.multi_reduction <add>, %20, %cst_10 [0] : vector<8x256xf32> to vector<256xf32>
    %22 = vector.shape_cast %21 : vector<256xf32> to vector<1x256xf32>
    %cst_11 = arith.constant 8.000000e+00 : f32
    %23 = vector.broadcast %cst_11 : f32 to vector<1x256xf32>
    %24 = arith.divf %22, %23 : vector<1x256xf32>
    %25 = vector.broadcast %17 : vector<1x256xf32> to vector<8x256xf32>
    %26 = arith.subf %13, %25 : vector<8x256xf32>
    %cst_12 = arith.constant 9.99999974E-6 : f32
    %27 = vector.broadcast %cst_12 : f32 to vector<1x256xf32>
    %28 = arith.addf %24, %27 : vector<1x256xf32>
    %29 = math.rsqrt %28 : vector<1x256xf32>
    %30 = vector.broadcast %29 : vector<1x256xf32> to vector<8x256xf32>
    %31 = arith.mulf %26, %30 : vector<8x256xf32>
    %32 = vector.broadcast %1 : vector<8x1xf32> to vector<8x256xf32>
    %33 = arith.mulf %31, %32 : vector<8x256xf32>
    %34 = vector.broadcast %2 : vector<8x1xf32> to vector<8x256xf32>
    %35 = arith.addf %33, %34 : vector<8x256xf32>
    %c1_i32 = arith.constant 1 : i32
    %36 = tpu.dynamic_rotate %35 by %c1_i32 dim 1 : vector<8x256xf32>, i32 -> vector<8x256xf32>
    %37 = vector.broadcast %8 : vector<1x256xf32> to vector<8x256xf32>
    %38 = arith.mulf %36, %37 : vector<8x256xf32>
    %c255_i32 = arith.constant 255 : i32
    %39 = tpu.dynamic_rotate %35 by %c255_i32 dim 1 : vector<8x256xf32>, i32 -> vector<8x256xf32>
    %40 = vector.broadcast %9 : vector<1x256xf32> to vector<8x256xf32>
    %41 = arith.mulf %39, %40 : vector<8x256xf32>
    %42 = vector.extract_strided_slice %7 {offsets = [0, 0], sizes = [8, 1], strides = [1, 1]} : vector<8x9xf32> to vector<8x1xf32>
    %43 = vector.broadcast %42 : vector<8x1xf32> to vector<8x256xf32>
    %44 = arith.mulf %43, %38 : vector<8x256xf32>
    %45 = vector.extract_strided_slice %7 {offsets = [0, 1], sizes = [8, 1], strides = [1, 1]} : vector<8x9xf32> to vector<8x1xf32>
    %46 = vector.broadcast %45 : vector<8x1xf32> to vector<8x256xf32>
    %47 = arith.mulf %46, %35 : vector<8x256xf32>
    %48 = arith.addf %44, %47 : vector<8x256xf32>
    %49 = vector.extract_strided_slice %7 {offsets = [0, 2], sizes = [8, 1], strides = [1, 1]} : vector<8x9xf32> to vector<8x1xf32>
    %50 = vector.broadcast %49 : vector<8x1xf32> to vector<8x256xf32>
    %51 = arith.mulf %50, %41 : vector<8x256xf32>
    %52 = arith.addf %48, %51 : vector<8x256xf32>
    %53 = vector.extract_strided_slice %7 {offsets = [0, 3], sizes = [8, 1], strides = [1, 1]} : vector<8x9xf32> to vector<8x1xf32>
    %54 = vector.broadcast %53 : vector<8x1xf32> to vector<8x256xf32>
    %55 = arith.mulf %54, %38 : vector<8x256xf32>
    %56 = vector.extract_strided_slice %7 {offsets = [0, 4], sizes = [8, 1], strides = [1, 1]} : vector<8x9xf32> to vector<8x1xf32>
    %57 = vector.broadcast %56 : vector<8x1xf32> to vector<8x256xf32>
    %58 = arith.mulf %57, %35 : vector<8x256xf32>
    %59 = arith.addf %55, %58 : vector<8x256xf32>
    %60 = vector.extract_strided_slice %7 {offsets = [0, 5], sizes = [8, 1], strides = [1, 1]} : vector<8x9xf32> to vector<8x1xf32>
    %61 = vector.broadcast %60 : vector<8x1xf32> to vector<8x256xf32>
    %62 = arith.mulf %61, %41 : vector<8x256xf32>
    %63 = arith.addf %59, %62 : vector<8x256xf32>
    %64 = vector.extract_strided_slice %7 {offsets = [0, 6], sizes = [8, 1], strides = [1, 1]} : vector<8x9xf32> to vector<8x1xf32>
    %65 = vector.broadcast %64 : vector<8x1xf32> to vector<8x256xf32>
    %66 = arith.mulf %65, %38 : vector<8x256xf32>
    %67 = vector.extract_strided_slice %7 {offsets = [0, 7], sizes = [8, 1], strides = [1, 1]} : vector<8x9xf32> to vector<8x1xf32>
    %68 = vector.broadcast %67 : vector<8x1xf32> to vector<8x256xf32>
    %69 = arith.mulf %68, %35 : vector<8x256xf32>
    %70 = arith.addf %66, %69 : vector<8x256xf32>
    %71 = vector.extract_strided_slice %7 {offsets = [0, 8], sizes = [8, 1], strides = [1, 1]} : vector<8x9xf32> to vector<8x1xf32>
    %72 = vector.broadcast %71 : vector<8x1xf32> to vector<8x256xf32>
    %73 = arith.mulf %72, %41 : vector<8x256xf32>
    %74 = arith.addf %70, %73 : vector<8x256xf32>
    %c16_i32 = arith.constant 16 : i32
    %75 = tpu.dynamic_rotate %52 by %c16_i32 dim 1 : vector<8x256xf32>, i32 -> vector<8x256xf32>
    %76 = vector.broadcast %10 : vector<1x256xf32> to vector<8x256xf32>
    %77 = arith.mulf %76, %75 : vector<8x256xf32>
    %78 = arith.addf %77, %63 : vector<8x256xf32>
    %c240_i32 = arith.constant 240 : i32
    %79 = tpu.dynamic_rotate %74 by %c240_i32 dim 1 : vector<8x256xf32>, i32 -> vector<8x256xf32>
    %80 = vector.broadcast %11 : vector<1x256xf32> to vector<8x256xf32>
    %81 = arith.mulf %80, %79 : vector<8x256xf32>
    %82 = arith.addf %78, %81 : vector<8x256xf32>
    %83 = vector.broadcast %3 : vector<8x1xf32> to vector<8x256xf32>
    %84 = arith.addf %82, %83 : vector<8x256xf32>
    %cst_13 = arith.constant dense<0.000000e+00> : vector<8xf32>
    %85 = vector.multi_reduction <add>, %35, %cst_13 [1] : vector<8x256xf32> to vector<8xf32>
    %86 = vector.shape_cast %85 : vector<8xf32> to vector<8x1xf32>
    %cst_14 = arith.constant 2.560000e+02 : f32
    %87 = vector.broadcast %cst_14 : f32 to vector<8x1xf32>
    %88 = arith.divf %86, %87 : vector<8x1xf32>
    %89 = vector.broadcast %88 : vector<8x1xf32> to vector<8x256xf32>
    %90 = arith.subf %35, %89 : vector<8x256xf32>
    %91 = arith.mulf %90, %90 : vector<8x256xf32>
    %cst_15 = arith.constant dense<0.000000e+00> : vector<8xf32>
    %92 = vector.multi_reduction <add>, %91, %cst_15 [1] : vector<8x256xf32> to vector<8xf32>
    %93 = vector.shape_cast %92 : vector<8xf32> to vector<8x1xf32>
    %cst_16 = arith.constant 2.560000e+02 : f32
    %94 = vector.broadcast %cst_16 : f32 to vector<8x1xf32>
    %95 = arith.divf %93, %94 : vector<8x1xf32>
    %cst_17 = arith.constant 9.99999974E-6 : f32
    %96 = vector.broadcast %cst_17 : f32 to vector<8x1xf32>
    %97 = arith.addf %95, %96 : vector<8x1xf32>
    %98 = math.rsqrt %97 : vector<8x1xf32>
    %99 = arith.mulf %4, %98 : vector<8x1xf32>
    %100 = vector.broadcast %99 : vector<8x1xf32> to vector<8x256xf32>
    %101 = arith.mulf %100, %35 : vector<8x256xf32>
    %102 = arith.subf %5, %99 : vector<8x1xf32>
    %103 = arith.mulf %102, %88 : vector<8x1xf32>
    %104 = vector.broadcast %103 : vector<8x1xf32> to vector<8x256xf32>
    %105 = arith.addf %101, %104 : vector<8x256xf32>
    %106 = vector.broadcast %6 : vector<8x1xf32> to vector<8x256xf32>
    %107 = arith.addf %105, %106 : vector<8x256xf32>
    %108 = arith.negf %107 : vector<8x256xf32>
    %109 = math.exp %108 : vector<8x256xf32>
    %cst_18 = arith.constant 1.000000e+00 : f32
    %110 = vector.broadcast %cst_18 : f32 to vector<8x256xf32>
    %111 = arith.addf %110, %109 : vector<8x256xf32>
    %112 = arith.divf %110, %111 : vector<8x256xf32>
    %113 = arith.mulf %35, %112 : vector<8x256xf32>
    %114 = vector.extract_strided_slice %113 {offsets = [0, 0], sizes = [1, 256], strides = [1, 1]} : vector<8x256xf32> to vector<1x256xf32>
    %115 = vector.extract_strided_slice %113 {offsets = [4, 0], sizes = [1, 256], strides = [1, 1]} : vector<8x256xf32> to vector<1x256xf32>
    %116 = vector.extract_strided_slice %113 {offsets = [1, 0], sizes = [1, 256], strides = [1, 1]} : vector<8x256xf32> to vector<1x256xf32>
    %117 = vector.extract_strided_slice %113 {offsets = [5, 0], sizes = [1, 256], strides = [1, 1]} : vector<8x256xf32> to vector<1x256xf32>
    %118 = vector.extract_strided_slice %113 {offsets = [2, 0], sizes = [1, 256], strides = [1, 1]} : vector<8x256xf32> to vector<1x256xf32>
    %119 = vector.extract_strided_slice %113 {offsets = [6, 0], sizes = [1, 256], strides = [1, 1]} : vector<8x256xf32> to vector<1x256xf32>
    %120 = vector.extract_strided_slice %113 {offsets = [3, 0], sizes = [1, 256], strides = [1, 1]} : vector<8x256xf32> to vector<1x256xf32>
    %121 = vector.extract_strided_slice %113 {offsets = [7, 0], sizes = [1, 256], strides = [1, 1]} : vector<8x256xf32> to vector<1x256xf32>
    %122 = tpu.concatenate %114, %115, %116, %117, %118, %119, %120, %121 in 0 : vector<1x256xf32>, vector<1x256xf32>, vector<1x256xf32>, vector<1x256xf32>, vector<1x256xf32>, vector<1x256xf32>, vector<1x256xf32>, vector<1x256xf32> -> vector<8x256xf32>
    %123 = arith.mulf %84, %122 : vector<8x256xf32>
    %124 = arith.addf %123, %13 : vector<8x256xf32>
    %c0_19 = arith.constant 0 : index
    %c0_20 = arith.constant 0 : index
    %c0_21 = arith.constant 0 : index
    %125 = vector.load %arg4[%c0_19, %c0_20, %c0_21] : memref<1x8x256xf32, #tpu.memory_space<vmem>>, vector<1x8x256xf32>
    %126 = vector.shape_cast %125 : vector<1x8x256xf32> to vector<8x256xf32>
    %127 = vector.shape_cast %124 : vector<8x256xf32> to vector<1x8x256xf32>
    tpu.vector_store %arg4[%c0_19, %c0_20, %c0_21], %127 {strides = array<i32>} : memref<1x8x256xf32, #tpu.memory_space<vmem>>, vector<1x8x256xf32>,
    return
  }
  func.func @transform_0(%arg0: i32) -> (i32, i32, i32) {
    %c0_i32 = arith.constant 0 : i32
    %c0_i32_0 = arith.constant 0 : i32
    %c0_i32_1 = arith.constant 0 : i32
    return %arg0, %c0_i32, %c0_i32_0 : i32, i32, i32
  }
  func.func @transform_1(%arg0: i32) -> (i32, i32) {
    %c0_i32 = arith.constant 0 : i32
    %c0_i32_0 = arith.constant 0 : i32
    %c0_i32_1 = arith.constant 0 : i32
    return %c0_i32, %c0_i32_0 : i32, i32
  }
  func.func @transform_2(%arg0: i32) -> (i32, i32) {
    %c0_i32 = arith.constant 0 : i32
    %c0_i32_0 = arith.constant 0 : i32
    %c0_i32_1 = arith.constant 0 : i32
    return %c0_i32, %c0_i32_0 : i32, i32
  }
  func.func @transform_3(%arg0: i32) -> (i32, i32, i32) {
    %c0_i32 = arith.constant 0 : i32
    %c0_i32_0 = arith.constant 0 : i32
    %c0_i32_1 = arith.constant 0 : i32
    return %arg0, %c0_i32, %c0_i32_0 : i32, i32, i32
  }
}

</mosaic_0001>

<bundles_post_ra>
// kernel: tpu_custom_call.1
= control target key start
LH: loop header
LB: loop body
LE: loop exit
PB: predicated region body
PF: predicated region fallthrough
CT: control target
= control target key end

     0   :  { %8 = vsyncpa [#allocation3], 0  ;;  %s1286_s0 = inlined_call_operand.hbm [shape: f32[2,8,256], index: 0, kind: input, shape index: {}]   ;;  %s1287_s1 = inlined_call_operand.hbm [shape: f32[8,15], index: 1, kind: input, shape index: {}]   ;;  %s1288_s2 = inlined_call_operand.hbm [shape: f32[4,256], index: 2, kind: input, shape index: {}]   ;;  %s1289_s3 = inlined_call_operand.hbm [shape: f32[2,8,256], index: 3, kind: output, shape index: {}]  }
   0x1   :  { %10 = vsyncpa [#allocation3 + $0x1], 0 }
   0x2   :  { %11 = vsyncpa [#allocation6], 0 }
   0x3   :  { %12 = vsyncpa [#allocation4], 0 }
   0x4   :  { %14 = vsyncpa [#allocation4 + $0x1], 0  ;;  %s1042_s12 = smov 0   ;;  %s1044_s13 = smov 0  }
   0x5   :  { %s1046_s14 = smov 0   ;;  %s1048_s15 = smov 0  }
   0x6 LB: > { %s1063_s16 = sadd.s32 4294967295, %s997_s15   ;;  %s693_s17 = sadd.s32 4294967294, %s997_s15   ;;  %s997_s15 = sphi %s1048_s15, %s1299_s15   ;;  %s993_s14 = sphi %s1046_s14, %s1298_s14   ;;  %s989_s13 = sphi %s1044_s13, %s1297_s13   ;;  %s985_s12 = sphi %s1042_s12, %s1296_s12  }
   0x7   : > { %p40_p0 = scmp.ne.s32.totalorder %s989_s13, %s985_s12  ;;  %p41_p1 = scmp.eq.s32.totalorder %s1063_s16, 0 }
   0x8   : > { %p106_p2 = scmp.eq.s32.totalorder %s1063_s16, 1  ;;  %p112_p3 = scmp.eq.s32.totalorder %s693_s17, 1 }
   0x9   : > { %p1072_p4 = por %p41_p1, %p40_p0  ;;  %p694_p5 = scmp.ge.s32.totalorder %s997_s15, 1 }
   0xa   : > { %p1077_p6 = por %p112_p3, %p40_p0  ;;  %p119_p7 = scmp.lt.s32.totalorder %s997_s15, 3 }
   0xb   : > { %s131_s22 = sshll.u32 %s1287_s1, 4  ;;  %s999_s24 = smov [#allocation5]   ;;  %s132_s22 = int_to_ptr.hbm [resolvable:$true] %s131_s22 }
   0xc   : > { %p1085_p8 = pnand %p694_p5, %p119_p7  ;;  %s133_s25 = sshll.u32 %s999_s24, 4  ;;  %s134_s25 = int_to_ptr.vmem [resolvable:$true] %s133_s25 }
   0xd   : > { %s143_s28 = sshll.u32 %s1288_s2, 4  ;;  %s1000_s29 = smov [#allocation7]   ;;  %s144_s28 = int_to_ptr.hbm [resolvable:$true] %s143_s28 }
   0xe   : > { %p727_p10 = pneg %p1085_p8  ;;  %s145_s30 = sshll.u32 %s1000_s29, 4  ;;  %s146_s30 = int_to_ptr.vmem [resolvable:$true] %s145_s30 }
   0xf   : > { %s1098_s4 = sadd.s32 1, %s997_s15   ;;  %s27_s5 = sadd.s32 1, %s993_s14 }
  0x10   : > { %p728_p11 = pnand %p727_p10, %p41_p1  ;;  %s24_s6 = ssub.s32 %s997_s15, %s1098_s4 }
  0x11   : > { %p34_p12 = scmp.ne.s32.totalorder %s993_s14, %s989_s13  ;;  %p25_p13 = scmp.eq.s32.totalorder %s24_s6, 0 }
  0x12   : > { %730 = dma.hbm_to_vmem [thread:$0]  (!%p728_p11), %s132_s22, 128, %s134_s25, [#allocation6]  }
  0x13   : > { %733 = dma.hbm_to_vmem [thread:$0]  (!%p728_p11), %s144_s28, 128, %s146_s30, [#allocation6]  }
  0x14   : > { %p35_p0 = scmp.eq.s32.totalorder %s997_s15, 0  ;;  %p1108_p3 = por %p106_p2, %p34_p12 }
  0x15   : > { %p744_p5 = scmp.lt.s32.totalorder %s997_s15, 2  ;;  %s156_s9 = sand.u32 1, %s993_s14  }
  0x16   : > { %s1114_s8 = scalar_select %p25_p13, %s993_s14, %s27_s5  }
  0x17   : > { %p36_p7 = por %p35_p0, %p34_p12  ;;  %s698_s10 = sshll.u32 %s156_s9, 4 }
  0x18   : > { %s713_s11 = sshll.u32 %s997_s15, 4  ;;  %s160_s22 = scalar_lea.vmem [#allocation2], %s698_s10 }
  0x19   : > { %s165_s21 = scalar_lea.hbm %s1286_s0, %s713_s11  ;;  %s169_s24 = sshll.u32 %s160_s22, 4  ;;  %s170_s24 = int_to_ptr.vmem [resolvable:$true] %s169_s24 }
  0x1a   : > { %s167_s25 = sshll.u32 %s165_s21, 4  ;;  %p1121_p2 = pnand %p744_p5, %p36_p7  ;;  %s168_s25 = int_to_ptr.hbm [resolvable:$true] %s167_s25 }
  0x1b   : > { %s157_s27 = scalar_lea.sflag [#allocation3], %s156_s9  ;;  %s897_s28 = sshra.s32 %s168_s25, 4  ;;  %s898_s28 = int_to_ptr.hbm [resolvable:$true] %s897_s28 }
  0x1c   : > { %s899_s29 = scalar_lea.hbm %s898_s28, 16  ;;  %p901_p11 = pneg %p1121_p2 }
  0x1d   : > { %p900_p10 = scmp.ne.s32.totalorder %s898_s28, %s899_s29  ;;  %s904_s6 = scalar_lea.hbm %s1286_s0, 32 }
  0x1e   : > { %p905_p0 = scmp.lt.s32.totalorder %s898_s28, %s1286_s0  ;;  %p906_p5 = scmp.lt.s32.totalorder %s904_s6, %s899_s29 }
  0x1f   : > { %p902_p12 = pnand %p901_p11, %p900_p10 }
  0x20   : > { %p907_p7 = por %p906_p5, %p905_p0 }
  0x21   : > { %p903_p13 = pneg %p902_p12 }
  0x23   : > { %p908_p9 = pnand %p907_p7, %p903_p13 }
  0x25   : > { %911 = shalt.err (!%p908_p9)
}
  0x26   : > { %737 = dma.hbm_to_vmem [thread:$0]  (!%p1121_p2), %s168_s25, 256, %s170_s24, %s157_s27  }
  0x27   : > { %178 = sbr.rel (%p1085_p8) target bundleno = 703 (0x2bf), region = 32  ;;  %s1138_s9 = sand.u32 (!%p1085_p8), 1, %s989_s13  }
  0x28   : > { %s702_s17 = sshll.u32 (!%p1085_p8), %s1138_s9, 4  ;;  %s181_s20 = scalar_lea.sflag (!%p1085_p8), [#allocation3], %s1138_s9 }
  0x29   : > { %s184_s21 = scalar_lea.vmem (!%p1085_p8), [#allocation2], %s702_s17 }
  0x2c   : > { %972 = dma.done.wait (%p1072_p4), %s181_s20, 256  }
  0x2d   : > { %974 = vsyncadd (%p1072_p4), %s181_s20, 4294967040 }
  0x2e   : > { %976 = dma.done.wait (%p41_p1), [#allocation6], 256  }
  0x2f   : > { %978 = vsyncadd (%p41_p1), [#allocation6], 4294967040  ;;  %v1001_v0 = vmov 0   ;;  %v1152_v1 = vld [vmem:[#allocation5] sm:$0xff]  ;;  %v1002_v2 = vmov 1   ;;  %v1003_v3 = vmov 8.0  }
  0x30   : > { %803 = vset.pattern.permute.xlu0 %v1001_v0  ;;  %819 = vrcp.f32 %v1003_v3  ;;  %v1156_v4 = vld [vmem:[%s184_s21] sm:$0xff]  ;;  %v1158_v5 = vld [vmem:[%s184_s21 + $0x8] sm:$0xff]  ;;  %v1004_v50 = vmov 7   ;;  %s1005_s18 = smov 127   ;;  %s1006_s23 = smov 1  }
  0x31   : > { %293 = vperm.xlu0 %803, %v1152_v1   ;;  %v228_v6 = vrot.slane %v1156_v4, 4  ;;  %v234_v7 = vrot.slane %v1158_v5, 4  ;;  %s1019_s22 = smov 16   ;;  %s1021_s24 = smov 112  }
  0x32   : > { %s714_s25 = sshll.u32 %s1063_s16, 4  ;;  %s217_s28 = scalar_lea.vmem [#allocation8], %s702_s17 }
  0x33   : > { %v229_v9 = vadd.f32 %v228_v6, %v1156_v4  ;;  %v235_v10 = vadd.f32 %v234_v7, %v1158_v5  ;;  %s599_s16 = scalar_lea.hbm %s1289_s3, %s714_s25  ;;  %s601_s29 = sshll.u32 %s217_s28, 4  ;;  %s602_s29 = int_to_ptr.vmem [resolvable:$true] %s601_s29 }
  0x34   : > { %s603_s30 = sshll.u32 %s599_s16, 4  ;;  %s588_s5 = scalar_lea.sflag [#allocation4], %s1138_s9  ;;  %s604_s30 = int_to_ptr.hbm [resolvable:$true] %s603_s30 }
  0x35   : > { %v230_v12 = vrot.slane %v229_v9, 2  ;;  %v236_v13 = vrot.slane %v235_v10, 2  ;;  %s941_s6 = sshra.s32 %s604_s30, 4  ;;  %s947_s20 = scalar_lea.hbm %s1289_s3, 32  ;;  %s942_s6 = int_to_ptr.hbm [resolvable:$true] %s941_s6 }
  0x36   : > { %v820_v8 = vpop.eup %819  ;;  %s943_s10 = scalar_lea.hbm %s942_s6, 16  ;;  %p948_p9 = scmp.lt.s32.totalorder %s942_s6, %s1289_s3 }
  0x37   : > { %v241_v11 = vmul.f32 8.0, %v820_v8  ;;  %v231_v15 = vadd.f32 %v230_v12, %v229_v9  ;;  %v237_v16 = vadd.f32 %v236_v13, %v235_v10  ;;  %vm245_vm0 = vweird.f32 %v820_v8  ;;  %p944_p1 = scmp.ne.s32.totalorder %s942_s6, %s943_s10  ;;  %p949_p2 = scmp.lt.s32.totalorder %s947_s20, %s943_s10 }
  0x38   : > { %v1007_v9 = vmov 14   ;;  %v1008_v10 = vmov 10  }
  0x39   : > { %804 = vset.pattern.permute.xlu0 %v1002_v2  ;;  %v242_v14 = vsub.f32 1.0, %v241_v11  ;;  %v232_v18 = vrot.slane %v231_v15, 1  ;;  %v238_v19 = vrot.slane %v237_v16, 1  ;;  %v1009_v11 = vmov 256.0   ;;  %p945_p4 = pnand %p944_p1, %p1108_p3  ;;  %p950_p10 = por %p949_p2, %p948_p9 }
  0x3a   : > { %299 = vperm.xlu0 %804, %v1152_v1  }
  0x3b   : > { %v243_v17 = vmul.f32 %v820_v8, %v242_v14  ;;  %v233_v21 = vadd.f32 %v232_v18, %v231_v15  ;;  %v239_v22 = vadd.f32 %v238_v19, %v237_v16  ;;  %p946_p8 = pneg %p945_p4 }
  0x3d   : > { %v244_v20 = vadd.f32 %v820_v8, %v243_v17  ;;  %p951_p11 = pnand %p950_p10, %p946_p8 }
  0x3f   : > { %v246_v23 = vsel %vm245_vm0, %v820_v8, %v244_v20 }
  0x40   : > { %v247_v24 = vmul.f32 %v246_v23, %v233_v21  ;;  %v248_v25 = vmul.f32 %v246_v23, %v239_v22  ;;  %v1010_v22 = vmov 13  }
  0x41   : > { %809 = vset.pattern.permute.xlu1 %v1010_v22  ;;  %v1020_v22 = vmov 2  }
  0x42   : > { %v249_v26 = vsub.f32 %v1156_v4, %v247_v24  ;;  %v250_v27 = vsub.f32 %v1158_v5, %v248_v25  ;;  %806 = vset.pattern.permute.xlu0 %v1004_v50 }
  0x44   : > { %v251_v28 = vmul.f32 %v249_v26, %v249_v26  ;;  %v252_v29 = vmul.f32 %v250_v27, %v250_v27 }
  0x46   : > { %v253_v30 = vrot.slane %v251_v28, 4  ;;  %v259_v31 = vrot.slane %v252_v29, 4 }
  0x48   : > { %v254_v32 = vadd.f32 %v253_v30, %v251_v28  ;;  %v260_v33 = vadd.f32 %v259_v31, %v252_v29  ;;  %v1011_v28 = vmov 6  }
  0x49   : > { %805 = vset.pattern.permute.xlu2 %v1011_v28 }
  0x4a   : > { %v255_v34 = vrot.slane %v254_v32, 2  ;;  %v261_v35 = vrot.slane %v260_v33, 2 }
  0x4c   : > { %v256_v36 = vadd.f32 %v255_v34, %v254_v32  ;;  %v262_v37 = vadd.f32 %v261_v35, %v260_v33 }
  0x4e   : > { %v257_v38 = vrot.slane %v256_v36, 1  ;;  %v263_v39 = vrot.slane %v262_v37, 1 }
  0x50   : > { %v258_v40 = vadd.f32 %v257_v38, %v256_v36  ;;  %v264_v41 = vadd.f32 %v263_v39, %v262_v37  ;;  %v1012_v38 = vmov 5   ;;  %v1013_v39 = vmov 8  }
  0x52   : > { %v265_v42 = vmul.f32 %v258_v40, %v246_v23  ;;  %v266_v43 = vmul.f32 %v264_v41, %v246_v23  ;;  %v1014_v40 = vmov 12   ;;  %v1015_v41 = vmov 3  }
  0x54   : > { %v267_v44 = vadd.f32 1e-05, %v265_v42  ;;  %v268_v45 = vadd.f32 1e-05, %v266_v43  ;;  %v1016_v42 = vmov 11   ;;  %v1017_v43 = vmov 4  }
  0x56   : > { %821 = vrsqrt.f32 %v267_v44  ;;  %vm275_vm1 = vweird.f32 %v267_v44  ;;  %vm285_vm3 = vweird.f32 %v268_v45 }
  0x57   : > { %823 = vrsqrt.f32 %v268_v45 }
  0x58   : > { %825 = vrcp.f32 %v1009_v11 }
  0x5c   : > { %v822_v46 = vpop.eup %821 }
  0x5d   : > { %v824_v47 = vpop.eup %823  ;;  %v270_v48 = vmul.f32 %v822_v46, %v267_v44  ;;  %vm276_vm2 = vweird.f32 %v822_v46 }
  0x5e   : > { %v280_v49 = vmul.f32 %v824_v47, %v268_v45  ;;  %vm286_vm4 = vweird.f32 %v824_v47  ;;  %vm277_vm5 = vmor %vm275_vm1, %vm276_vm2  ;;  %v826_v12 = vpop.eup %825  ;;  %vm560_vm1 = vcmask 1040384  }
  0x5f   : > { %v271_v51 = vmul.f32 %v822_v46, %v270_v48  ;;  %vm287_vm6 = vmor %vm285_vm3, %vm286_vm4  ;;  %v442_v13 = vmul.f32 256.0, %v826_v12  ;;  %vm446_vm7 = vweird.f32 %v826_v12  ;;  %v308_v48 = vlaneseq }
  0x60   : > { %v281_v52 = vmul.f32 %v824_v47, %v280_v49  ;;  %vm563_vm3 = vcmask 1041408  }
  0x61   : > { %v272_v53 = vmul.f32 0.5, %v271_v51  ;;  %v443_v14 = vsub.f32 1.0, %v442_v13  ;;  %v1194_v50 = vand.u32 127, %v308_v48 }
  0x62   : > { %v282_v54 = vmul.f32 0.5, %v281_v52  ;;  %v219_v52 = vld [vmem:[#allocation7] ss:$4 sm:$0x3] }
  0x63   : > { %v273_v55 = vsub.f32 1.5, %v272_v53  ;;  %v444_v15 = vmul.f32 %v826_v12, %v443_v14  ;;  %v1018_v53 = vmov 9   ;;  %vm310_vm11 = vcmp.lt.s32.totalorder %v1194_v50, 1 }
  0x64   : > { %v283_v56 = vsub.f32 1.5, %v282_v54  ;;  %vm324_vm12 = vcmp.lt.s32.totalorder %v1194_v50, 127  ;;  %vm404_vm13 = vcmp.lt.s32.totalorder %v1194_v50, 16  ;;  %vm420_vm14 = vcmp.lt.s32.totalorder %v1194_v50, 112 }
  0x65   : > { %v274_v57 = vmul.f32 %v822_v46, %v273_v55  ;;  %v445_v16 = vadd.f32 %v826_v12, %v444_v15  ;;  %v314_v55 = vperm.slane %v219_v52, 0 }
  0x66   : > { %v284_v58 = vmul.f32 %v824_v47, %v283_v56  ;;  %v315_v56 = vperm.slane %v219_v52, 1 }
  0x67   : > { %v278_v60 = vsel %vm277_vm5, %v822_v46, %v274_v57  ;;  %v447_v17 = vsel %vm446_vm7, %v826_v12, %v445_v16 }
  0x68   : > { %v288_v61 = vsel %vm287_vm6, %v824_v47, %v284_v58  ;;  %v289_v62 = vmul.f32 %v278_v60, %v249_v26  ;;  %v221_v60 = vld [vmem:[#allocation7 + $0x1] ss:$4 sm:$0x3] }
  0x69   : > { %v290_v63 = vmul.f32 %v288_v61, %v250_v27 }
  0xa3   : > { %v294_v59 = vpop.permute.xlu0 %293 }
  0xa4   : > { %v296_v0 = vmul.f32 %v294_v59, %v289_v62  ;;  %v297_v2 = vmul.f32 %v294_v59, %v290_v63  ;;  %v328_v63 = vperm.slane %v221_v60, 0 }
  0xac   : > { %v300_v3 = vpop.permute.xlu0 %299 }
  0xad   : > { %v1166_v6 = vadd.f32 %v300_v3, %v296_v0  ;;  %v1168_v7 = vadd.f32 %v300_v3, %v297_v2  ;;  %v329_v0 = vperm.slane %v221_v60, 1 }
  0xaf   : > { %322 = vrot.lane.b32.xlu0 %v1168_v7, %s1005_s18  ;;  %304 = vrot.lane.b32.xlu2 %v1166_v6, %s1006_s23  ;;  %v438_v8 = vadd.f32 %v1168_v7, %v1166_v6 }
  0xb1   : > { %439 = vadd.xlane.f32.xlu1 %v438_v8 }
  0xb7   : > { %341 = vperm.xlu0 %806, %v1152_v1  }
  0xbf   : > { %810 = vset.pattern.permute.xlu0 %v1007_v9 }
  0xc0   : > { %393 = vperm.xlu0 %810, %v1152_v1  }
  0xc8   : > { %815 = vset.pattern.permute.xlu0 %v1008_v10 }
  0xc9   : > { %363 = vperm.xlu0 %815, %v1152_v1  }
  0xd1   : > { %818 = vset.pattern.permute.xlu0 %v1012_v38 }
 0x109   : > { %v305_v44 = vpop.permute.xlu2 %304 }
 0x121   : > { %v323_v51 = vpop.permute.xlu0 %322 }
 0x124   : > { %v440_v18 = vpop.xlane.xlu1 %439 }
 0x125   : > { %v448_v19 = vmul.f32 %v447_v17, %v440_v18 }
 0x127   : > { %v449_v20 = vsub.f32 %v1166_v6, %v448_v19  ;;  %v450_v21 = vsub.f32 %v1168_v7, %v448_v19 }
 0x129   : > { %v451_v23 = vmul.f32 %v449_v20, %v449_v20  ;;  %v452_v24 = vmul.f32 %v450_v21, %v450_v21  ;;  %v342_v2 = vpop.permute.xlu0 %341 }
 0x12a   : > { %v344_v11 = vmul.f32 %v342_v2, %v1166_v6  ;;  %v345_v12 = vmul.f32 %v342_v2, %v1168_v7 }
 0x12b   : > { %v453_v25 = vadd.f32 %v452_v24, %v451_v23 }
 0x12d   : > { %454 = vadd.xlane.f32.xlu1 %v453_v25 }
 0x146   : > { %306 = vrot.lane.b32.xlu1 %v1168_v7, %s1006_s23 }
 0x14e   : > { %385 = vperm.xlu1 %809, %v1152_v1  }
 0x156   : > { %812 = vset.pattern.permute.xlu1 %v1017_v43 }
 0x1a0   : > { %v455_v26 = vpop.xlane.xlu1 %454 }
 0x1a1   : > { %v456_v27 = vmul.f32 %v455_v26, %v447_v17 }
 0x1a3   : > { %v457_v29 = vadd.f32 1e-05, %v456_v27 }
 0x1a5   : > { %827 = vrsqrt.f32 %v457_v29  ;;  %vm464_vm9 = vweird.f32 %v457_v29 }
 0x1ab   : > { %v828_v30 = vpop.eup %827 }
 0x1ac   : > { %v459_v31 = vmul.f32 %v828_v30, %v457_v29  ;;  %vm465_vm8 = vweird.f32 %v828_v30  ;;  %v394_v29 = vpop.permute.xlu0 %393 }
 0x1ad   : > { %vm466_vm10 = vmor %vm464_vm9, %vm465_vm8  ;;  %vm566_vm9 = vcmask 1042432  }
 0x1ae   : > { %v460_v32 = vmul.f32 %v828_v30, %v459_v31 }
 0x1b0   : > { %v461_v33 = vmul.f32 0.5, %v460_v32 }
 0x1b2   : > { %v462_v34 = vsub.f32 1.5, %v461_v33 }
 0x1b4   : > { %v463_v35 = vmul.f32 %v828_v30, %v462_v34 }
 0x1b6   : > { %v467_v36 = vsel %vm466_vm10, %v828_v30, %v463_v35  ;;  %vm569_vm10 = vcmask 1043456  }
 0x1b7   : > { %v468_v37 = vmul.f32 %v467_v36, %v1152_v1 }
 0x1b8   : > { %v307_v54 = vpop.permute.xlu1 %306 }
 0x1b9   : > { %476 = vrot.lane.b32.xlu2 %v468_v37, %s1006_s23  ;;  %v311_v58 = vsel %vm310_vm11, %v305_v44, %v307_v54  ;;  %v312_v59 = vsel %vm310_vm11, %v307_v54, %v305_v44  ;;  %v223_v54 = vld [vmem:[#allocation7 + $0x2] ss:$4 sm:$0x3]  ;;  %vm572_vm11 = vcmask 1044480  }
 0x1ba   : > { %v1199_v61 = vmul.f32 %v314_v55, %v312_v59  ;;  %v1201_v62 = vmul.f32 %v315_v56, %v311_v58  ;;  %v1214_v56 = vld [vmem:[#allocation7 + $0x3] ss:$4 sm:$0x3] }
 0x1c0   : > { %v386_v23 = vpop.permute.xlu1 %385 }
 0x1c1   : > { %320 = vrot.lane.b32.xlu2 %v1166_v6, %s1005_s18  ;;  %v388_v25 = vmul.f32 %v386_v23, %v1166_v6  ;;  %v389_v26 = vmul.f32 %v386_v23, %v1168_v7 }
 0x1c9   : > { %335 = vperm.xlu2 %805, %v1152_v1  }
 0x1d1   : > { %807 = vset.pattern.permute.xlu2 %v1013_v39 }
 0x1d2   : > { %349 = vperm.xlu2 %807, %v1152_v1  }
 0x1da   : > { %808 = vset.pattern.permute.xlu2 %v1014_v40 }
 0x1db   : > { %379 = vperm.xlu2 %808, %v1152_v1  }
 0x1e3   : > { %811 = vset.pattern.permute.xlu2 %v1015_v41 }
 0x1e4   : > { %471 = vperm.xlu2 %811, %v468_v37  }
 0x1ec   : > { %813 = vset.pattern.permute.xlu2 %v1012_v38 }
 0x1ed   : > { %489 = vperm.xlu2 %813, %v1152_v1  }
 0x1f5   : > { %816 = vset.pattern.permute.xlu2 %v1016_v42 }
 0x1f6   : > { %371 = vperm.xlu2 %816, %v1152_v1  }
 0x1fe   : > { %817 = vset.pattern.permute.xlu2 %v1020_v22 }
 0x213   : > { %v477_v45 = vpop.permute.xlu2 %476 }
 0x214   : > { %v479_v46 = vsub.f32 %v1152_v1, %v477_v45 }
 0x216   : > { %v480_v47 = vmul.f32 %v479_v46, %v448_v19 }
 0x218   : > { %483 = vperm.xlu1 %812, %v480_v47  }
 0x21b   : > { %v321_v49 = vpop.permute.xlu2 %320 }
 0x21c   : > { %v325_v3 = vsel %vm324_vm12, %v321_v49, %v323_v51  ;;  %v326_v8 = vsel %vm324_vm12, %v323_v51, %v321_v49  ;;  %vm575_vm12 = vcmask 1045504  }
 0x21d   : > { %v332_v13 = vmul.f32 %v328_v63, %v325_v3  ;;  %v333_v14 = vmul.f32 %v329_v0, %v326_v8  ;;  %v408_v3 = vperm.slane %v223_v54, 0 }
 0x21f   : > { %v397_v32 = vmul.f32 %v394_v29, %v333_v14  ;;  %v396_v33 = vmul.f32 %v394_v29, %v332_v13 }
 0x220   : > { %814 = vset.pattern.permute.xlu1 %v1018_v53  ;;  %v364_v53 = vpop.permute.xlu0 %363 }
 0x221   : > { %357 = vperm.xlu1 %814, %v1152_v1   ;;  %v366_v58 = vmul.f32 %v364_v53, %v1166_v6  ;;  %v367_v59 = vmul.f32 %v364_v53, %v1168_v7 }
 0x223   : > { %v336_v57 = vpop.permute.xlu2 %335 }
 0x224   : > { %v338_v9 = vmul.f32 %v336_v57, %v1199_v61  ;;  %v339_v10 = vmul.f32 %v336_v57, %v1201_v62 }
 0x226   : > { %v346_v16 = vadd.f32 %v344_v11, %v338_v9  ;;  %v347_v17 = vadd.f32 %v345_v12, %v339_v10  ;;  %v409_v10 = vperm.slane %v223_v54, 1  ;;  %v424_v12 = vperm.slane %v1214_v56, 0 }
 0x22c   : > { %v350_v15 = vpop.permute.xlu2 %349 }
 0x22d   : > { %v352_v18 = vmul.f32 %v350_v15, %v332_v13  ;;  %v353_v19 = vmul.f32 %v350_v15, %v333_v14 }
 0x22f   : > { %v354_v20 = vadd.f32 %v352_v18, %v346_v16  ;;  %v355_v21 = vadd.f32 %v353_v19, %v347_v17 }
 0x231   : > { %402 = vrot.lane.b32.xlu2 %v355_v21, %s1019_s22  ;;  %400 = vrot.lane.b32.xlu1 %v354_v20, %s1019_s22 }
 0x235   : > { %v380_v24 = vpop.permute.xlu2 %379 }
 0x236   : > { %v382_v27 = vmul.f32 %v380_v24, %v1199_v61  ;;  %v383_v28 = vmul.f32 %v380_v24, %v1201_v62 }
 0x238   : > { %v390_v30 = vadd.f32 %v388_v25, %v382_v27  ;;  %v391_v31 = vadd.f32 %v389_v26, %v383_v28 }
 0x239   : > { %433 = vperm.xlu2 %817, %v1152_v1  }
 0x23a   : > { %v399_v34 = vadd.f32 %v397_v32, %v391_v31  ;;  %v398_v35 = vadd.f32 %v396_v33, %v390_v30 }
 0x23c   : > { %418 = vrot.lane.b32.xlu0 %v399_v34, %s1021_s24  ;;  %416 = vrot.lane.b32.xlu1 %v398_v35, %s1021_s24 }
 0x23e   : > { %v472_v36 = vpop.permute.xlu2 %471 }
 0x23f   : > { %v474_v37 = vmul.f32 %v472_v36, %v1166_v6  ;;  %v475_v38 = vmul.f32 %v472_v36, %v1168_v7 }
 0x247   : > { %v490_v42 = vpop.permute.xlu2 %489 }
 0x250   : > { %v372_v52 = vpop.permute.xlu2 %371 }
 0x251   : > { %v374_v60 = vmul.f32 %v372_v52, %v332_v13  ;;  %v375_v0 = vmul.f32 %v372_v52, %v333_v14  ;;  %v425_v13 = vperm.slane %v1214_v56, 1 }
 0x28a   : > { %v484_v39 = vpop.permute.xlu1 %483 }
 0x28b   : > { %v486_v40 = vadd.f32 %v484_v39, %v474_v37  ;;  %v487_v41 = vadd.f32 %v484_v39, %v475_v38  ;;  %v403_v20 = vpop.permute.xlu2 %402 }
 0x28d   : > { %v492_v43 = vadd.f32 %v490_v42, %v486_v40  ;;  %v493_v44 = vadd.f32 %v490_v42, %v487_v41 }
 0x28f   : > { %v706_v45 = vmul.f32 -1.442695, %v492_v43  ;;  %v707_v46 = vmul.f32 -1.442695, %v493_v44 }
 0x291   : > { %829 = vpow2.f32 %v706_v45 }
 0x292   : > { %831 = vpow2.f32 %v707_v46 }
 0x293   : > { %v358_v51 = vpop.permute.xlu1 %357  ;;  %v434_v53 = vpop.permute.xlu2 %433 }
 0x294   : > { %v360_v9 = vmul.f32 %v358_v51, %v1199_v61  ;;  %v361_v17 = vmul.f32 %v358_v51, %v1201_v62 }
 0x296   : > { %v368_v24 = vadd.f32 %v366_v58, %v360_v9  ;;  %v369_v27 = vadd.f32 %v367_v59, %v361_v17 }
 0x297   : > { %v830_v1 = vpop.eup %829 }
 0x298   : > { %v832_v47 = vpop.eup %831  ;;  %v500_v48 = vadd.f32 1.0, %v830_v1  ;;  %v376_v36 = vadd.f32 %v374_v60, %v368_v24  ;;  %v377_v38 = vadd.f32 %v375_v0, %v369_v27 }
 0x299   : > { %v501_v49 = vadd.f32 1.0, %v832_v47 }
 0x29a   : > { %833 = vrcp.f32 %v500_v48  ;;  %v513_v15 = vand.u32 2147483648, %v500_v48  ;;  %v511_v18 = vand.u32 2147483647, %v500_v48  ;;  %vm507_vm2 = vweird.f32 %v500_v48 }
 0x29b   : > { %835 = vrcp.f32 %v501_v49  ;;  %v528_v19 = vand.u32 2147483648, %v501_v49  ;;  %v526_v61 = vand.u32 2147483647, %v501_v49  ;;  %vm522_vm5 = vweird.f32 %v501_v49 }
 0x29c   : > { %v514_v25 = vor.u32 1.1754944e-38, %v513_v15  ;;  %vm512_vm6 = vcmp.eq.f32.partialorder %v511_v18, 8.507059e+37 }
 0x29d   : > { %v529_v29 = vor.u32 1.1754944e-38, %v528_v19  ;;  %vm527_vm8 = vcmp.eq.f32.partialorder %v526_v61, 8.507059e+37 }
 0x2a0   : > { %v834_v55 = vpop.eup %833 }
 0x2a1   : > { %v836_v57 = vpop.eup %835  ;;  %v503_v63 = vmul.f32 %v834_v55, %v500_v48  ;;  %vm508_vm15 = vweird.f32 %v834_v55 }
 0x2a2   : > { %v518_v2 = vmul.f32 %v836_v57, %v501_v49  ;;  %vm523_vm0 = vweird.f32 %v836_v57  ;;  %vm509_vm4 = vmor %vm507_vm2, %vm508_vm15 }
 0x2a3   : > { %v504_v8 = vsub.f32 1.0, %v503_v63  ;;  %v401_v11 = vpop.permute.xlu1 %400  ;;  %vm524_vm7 = vmor %vm522_vm5, %vm523_vm0 }
 0x2a4   : > { %v519_v16 = vsub.f32 1.0, %v518_v2  ;;  %v406_v22 = vsel %vm404_vm13, %v403_v20, %v401_v11  ;;  %v405_v62 = vsel %vm404_vm13, %v401_v11, %v403_v20  ;;  %vm578_vm13 = vcmask 1046528  }
 0x2a5   : > { %v505_v14 = vmul.f32 %v834_v55, %v504_v8  ;;  %v412_v30 = vmul.f32 %v408_v3, %v406_v22  ;;  %v413_v33 = vmul.f32 %v409_v10, %v405_v62 }
 0x2a6   : > { %v520_v21 = vmul.f32 %v836_v57, %v519_v16 }
 0x2a7   : > { %v506_v23 = vadd.f32 %v834_v55, %v505_v14  ;;  %v414_v39 = vadd.f32 %v412_v30, %v376_v36  ;;  %v415_v43 = vadd.f32 %v413_v33, %v377_v38 }
 0x2a8   : > { %v521_v26 = vadd.f32 %v836_v57, %v520_v21 }
 0x2a9   : > { %v510_v28 = vsel %vm509_vm4, %v834_v55, %v506_v23 }
 0x2aa   : > { %v515_v31 = vsel %vm512_vm6, %v514_v25, %v510_v28  ;;  %v525_v32 = vsel %vm524_vm7, %v836_v57, %v521_v26 }
 0x2ab   : > { %v530_v34 = vsel %vm527_vm8, %v529_v29, %v525_v32  ;;  %v532_v35 = vmul.f32 %v515_v31, %v1166_v6 }
 0x2ac   : > { %v533_v37 = vmul.f32 %v530_v34, %v1168_v7 }
 0x2ad   : > { %v536_v40 = vrot.slane %v532_v35, 3  ;;  %v540_v45 = vrot.slane %v532_v35, 7  ;;  %v544_v7 = vrot.slane %v532_v35, 2  ;;  %v548_v47 = vrot.slane %v532_v35, 6 }
 0x2ae   : > { %v419_v41 = vpop.permute.xlu0 %418  ;;  %v417_v42 = vpop.permute.xlu1 %416  ;;  %v537_v44 = vrot.slane %v533_v37, 3  ;;  %v541_v46 = vrot.slane %v533_v37, 7  ;;  %v545_v51 = vrot.slane %v533_v37, 2  ;;  %v549_v52 = vrot.slane %v533_v37, 6 }
 0x2af   : > { %v421_v6 = vsel %vm420_vm14, %v417_v42, %v419_v41  ;;  %v422_v1 = vsel %vm420_vm14, %v419_v41, %v417_v42  ;;  %v552_v54 = vrot.slane %v532_v35, 1  ;;  %v553_v55 = vrot.slane %v533_v37, 1 }
 0x2b0   : > { %v428_v48 = vmul.f32 %v424_v12, %v421_v6  ;;  %v429_v49 = vmul.f32 %v425_v13, %v422_v1  ;;  %v561_v56 = vsel %vm560_vm1, %v532_v35, %v536_v40  ;;  %v562_v57 = vsel %vm560_vm1, %v533_v37, %v537_v44 }
 0x2b1   : > { %v564_v60 = vsel %vm563_vm3, %v561_v56, %v540_v45  ;;  %v565_v50 = vsel %vm563_vm3, %v562_v57, %v541_v46  ;;  %v556_v63 = vrot.slane %v532_v35, 5  ;;  %v557_v0 = vrot.slane %v533_v37, 5 }
 0x2b2   : > { %v430_v58 = vadd.f32 %v428_v48, %v414_v39  ;;  %v431_v59 = vadd.f32 %v429_v49, %v415_v43  ;;  %v567_v2 = vsel %vm566_vm9, %v564_v60, %v544_v7  ;;  %v568_v3 = vsel %vm566_vm9, %v565_v50, %v545_v51 }
 0x2b3   : > { %v570_v10 = vsel %vm569_vm10, %v567_v2, %v548_v47  ;;  %v571_v11 = vsel %vm569_vm10, %v568_v3, %v549_v52 }
 0x2b4   : > { %v436_v8 = vadd.f32 %v434_v53, %v430_v58  ;;  %v437_v9 = vadd.f32 %v434_v53, %v431_v59  ;;  %v573_v12 = vsel %vm572_vm11, %v570_v10, %v552_v54  ;;  %v574_v15 = vsel %vm572_vm11, %v571_v11, %v553_v55 }
 0x2b5   : > { %v576_v16 = vsel %vm575_vm12, %v573_v12, %v556_v63  ;;  %v577_v17 = vsel %vm575_vm12, %v574_v15, %v557_v0 }
 0x2b6   : > { %v579_v13 = vsel %vm578_vm13, %v576_v16, %v532_v35  ;;  %v580_v14 = vsel %vm578_vm13, %v577_v17, %v533_v37 }
 0x2b7   : > { %v581_v18 = vmul.f32 %v579_v13, %v436_v8  ;;  %v582_v19 = vmul.f32 %v580_v14, %v437_v9 }
 0x2b9   : > { %v583_v20 = vadd.f32 %v581_v18, %v1156_v4  ;;  %v584_v21 = vadd.f32 %v582_v19, %v1158_v5 }
 0x2bb   : > { %585 = vst [vmem:[%s217_s28] sm:$0xff] %v583_v20 }
 0x2bc   : > { %586 = vst [vmem:[%s217_s28 + $0x8] sm:$0xff] %v584_v21 }
 0x2bd   : > { %954 = shalt.err (!%p951_p11)
}
 0x2be   : > { %725 = dma.vmem_to_hbm [thread:$0]  (%p1108_p3), %s602_s29, 256, %s604_s30, %s588_s5  }
 0x2bf PF: > { %s615_s9 = sand.u32 1, %s985_s12   ;;  %p1295_p12 = scmp.ge.s32.totalorder %s997_s15, 2 }
 0x2c0   : > { %s616_s23 = scalar_lea.sflag [#allocation4], %s615_s9 }
 0x2c1   : > { %p739_p13 = pnand %p1295_p12, %p1077_p6 }
 0x2c3   : > { %p740_p0 = pneg %p739_p13 }
 0x2c5   : > { %980 = dma.done.wait (%p740_p0), %s616_s23, 256  }
 0x2c6   : > { %982 = vsyncadd (%p740_p0), %s616_s23, 4294967040  ;;  %p17_p5 = scmp.ge.s32.totalorder %s1098_s4, 4   ;;  %s1296_s12 = smov %s989_s13 }
 0x2c7   : > { %s1297_s13 = smov %s993_s14  ;;  %s1298_s14 = smov %s1114_s8 }
 0x2c8   : > { %s1299_s15 = smov %s1098_s4  ;;  %19 = sbr.rel (!%p17_p5) target bundleno = 6 (0x6), region = 88 }
 0x2cd   :  { %622 = vsyncpa [#allocation3], 1 }
 0x2ce   :  { %624 = vsyncpa [#allocation3 + $0x1], 1 }
 0x2cf   :  { %625 = vsyncpa [#allocation6], 1 }
 0x2d0   :  { %626 = vsyncpa [#allocation4], 1 }
 0x2d1   :  { %628 = vsyncpa [#allocation4 + $0x1], 1 }

</bundles_post_ra>
